<compile_context>
chip_gen: v7x
topology: tpu7x:2x2x1
jax: 0.10.0
libtpu: 0.0.40
codegen_flags: <defaults>
</compile_context>

<pallas_src>
import functools
import math

import jax
import jax.numpy as jnp
from jax.experimental import pallas as pl
from jax.experimental.pallas import tpu as pltpu


# ----------------------------- Param (synthetic) -----------------------------
class Param:
    batch_size = 2
    max_subobs_num = 4
    obs_feat_in_num = 8
    obs_feat_out_num = 16
    max_subgate_num = 4
    gate_feat_in_num = 8
    gate_feat_out_num = 16
    subroom_emb_size_in = (max_subobs_num * obs_feat_out_num
                           + max_subgate_num * gate_feat_out_num)   # 128
    room_emb_size = 32


def _ru(x, m):
    return (x + m - 1) // m * m


# ------------------------------- Pallas kernel -------------------------------
def obs_embedding_kernel(xo_ref, xg_ref, w_ref, b_ref, out_ref, *,
                         r_wg, r_w2, L, room):
    """One fused step:
         h   = relu(x_obs @ W1_obs + x_gate @ W1_gate + b1)   (f32 epilogue)
         out = h @ W2[:, :room] + b2                           (f32 accumulate)
    xo_ref : (b_tile, d_obs_in)   activation tile (obs items flattened)
    xg_ref : (b_tile, d_gate_in)  activation tile (gate items flattened)
    w_ref  : (n_rows, L)          packed [W1_obs ; W1_gate ; W2], 16-row aligned
    b_ref  : (8, L)   f32         row 0 = b1 (tiled), row 1 = b2 (padded)
    out_ref: (b_tile, room)       room embedding (narrow lane store)
    """
    d_obs = xo_ref.shape[1]
    d_gate = xg_ref.shape[1]

    # stage 1: per-item linears as two block-diagonal MXU matmuls, f32 acc
    h = jnp.dot(xo_ref[...], w_ref[0:d_obs, :],
                preferred_element_type=jnp.float32)
    h = h + jnp.dot(xg_ref[...], w_ref[r_wg:r_wg + d_gate, :],
                    preferred_element_type=jnp.float32)
    # fcnn_po ReLU + tiled stage-1 bias (f32 epilogue)
    h = jnp.maximum(h + b_ref[0:1, :], 0.0)

    # stage 2: fcnn_po Linear, single K=L pass, narrow (room-wide) output
    out = jnp.dot(h.astype(w_ref.dtype), w_ref[r_w2:r_w2 + L, 0:room],
                  preferred_element_type=jnp.float32)
    out_ref[...] = (out + b_ref[1:2, 0:room]).astype(out_ref.dtype)


# --------------------------- weight packing (hoisted) -------------------------
def _block_diag(w, n):
    """w: (f_in, f_out) -> block-diagonal (n*f_in, n*f_out)."""
    f_in, f_out = w.shape
    eye = jnp.eye(n, dtype=w.dtype)
    return (eye[:, None, :, None] * w[None, :, None, :]).reshape(n * f_in, n * f_out)


def pack_weights(params, n_obs, n_gate, compute_dtype=jnp.bfloat16):
    """Pack all weights/biases into two kernel operands.

    Call ONCE per parameter update and reuse the returned buffers for every
    forward call (this packing is ~a dozen small XLA ops that would otherwise
    dominate small-batch / inference wall-clock).
    Returns (w_packed, bias, meta).
    """
    f_obs_in, f_obs_out = params["w_obs"].shape
    f_gate_in, f_gate_out = params["w_gate"].shape
    d_hid, room = params["w_po"].shape
    d_obs_in, d_gate_in = n_obs * f_obs_in, n_gate * f_gate_in
    d_obs_out, d_gate_out = n_obs * f_obs_out, n_gate * f_gate_out
    assert d_obs_out + d_gate_out == d_hid

    L = max(128, _ru(d_hid, 128))          # lane-dense hidden width
    A = 16                                  # row alignment (vreg-aligned for f32 & bf16)
    r_wg = _ru(d_obs_in, A)
    r_w2 = _ru(r_wg + d_gate_in, A)
    n_rows = _ru(r_w2 + L, A)

    # stage-1 block-diagonal weights (obs cols [0:d_obs_out], gate cols after),
    # stage-2 weight padded to L rows / room cols
    w = jnp.zeros((n_rows, L), jnp.float32)
    w = w.at[:d_obs_in, :d_obs_out].set(_block_diag(params["w_obs"], n_obs))
    w = w.at[r_wg:r_wg + d_gate_in, d_obs_out:d_hid].set(
        _block_diag(params["w_gate"], n_gate))
    w = w.at[r_w2:r_w2 + d_hid, :room].set(params["w_po"])
    w = w.astype(compute_dtype)

    # biases stay f32 (f32 epilogue in the kernel)
    b = jnp.zeros((8, L), jnp.float32)
    b = b.at[0, :d_obs_out].set(jnp.tile(params["b_obs"].reshape(-1), n_obs))
    b = b.at[0, d_obs_out:d_hid].set(jnp.tile(params["b_gate"].reshape(-1), n_gate))
    b = b.at[1, :room].set(params["b_po"].reshape(-1))

    meta = dict(r_wg=r_wg, r_w2=r_w2, L=L, room=room,
                d_obs_in=d_obs_in, d_gate_in=d_gate_in)
    return w, b, meta


# ------------------------------- forward wrapper ------------------------------
def obs_embedding_forward(sub_obs_info, sub_gate_info, packed, *,
                          b_tile_max=4096, out_dtype=jnp.float32):
    """sub_obs_info: (B, N_obs, F_obs_in); sub_gate_info: (B, N_gate, F_gate_in).
    `packed` is the (w, b, meta) tuple from pack_weights (computed once)."""
    w, b, meta = packed
    B = sub_obs_info.shape[0]
    d_obs_in, d_gate_in = meta["d_obs_in"], meta["d_gate_in"]
    room = meta["room"]
    cdtype = w.dtype

    # free reshape views + cast; NO concat (kernel takes two inputs)
    x_obs = sub_obs_info.reshape(B, d_obs_in).astype(cdtype)
    x_gate = sub_gate_info.reshape(B, d_gate_in).astype(cdtype)

    # batch tiling: multiple-of-8 padding, adaptive tile size, >=2 grid steps
    # when B >= 16 so "parallel" shards across v7x's two TensorCores.
    B8 = _ru(B, 8)
    n_steps = 1 if B8 <= 8 else max(2, pl.cdiv(B8, b_tile_max))
    b_tile = _ru(pl.cdiv(B8, n_steps), 8)
    B_pad = n_steps * b_tile
    if B_pad != B:
        x_obs = jnp.pad(x_obs, ((0, B_pad - B), (0, 0)))
        x_gate = jnp.pad(x_gate, ((0, B_pad - B), (0, 0)))

    kernel = functools.partial(obs_embedding_kernel,
                               r_wg=meta["r_wg"], r_w2=meta["r_w2"],
                               L=meta["L"], room=room)

    out = pl.pallas_call(
        kernel,
        out_shape=jax.ShapeDtypeStruct((B_pad, room), out_dtype),
        grid=(n_steps,),
        in_specs=[pl.BlockSpec((b_tile, d_obs_in), lambda i: (i, 0)),
                  pl.BlockSpec((b_tile, d_gate_in), lambda i: (i, 0)),
                  pl.BlockSpec(w.shape, lambda i: (0, 0)),
                  pl.BlockSpec(b.shape, lambda i: (0, 0))],
        out_specs=pl.BlockSpec((b_tile, room), lambda i: (i, 0)),
        compiler_params=pltpu.CompilerParams(
            dimension_semantics=("parallel",)),
    )(x_obs, x_gate, w, b)

    return out[:B] if B_pad != B else out


# --------------------------- deterministic init -------------------------------
def _xavier_like(key, in_f, out_f):
    # matches _init_weights: xavier_uniform with gain sqrt(2/(fanin+fanout))
    gain = math.sqrt(2.0 / (in_f + out_f))
    bound = gain * math.sqrt(6.0 / (in_f + out_f))
    # stored transposed: (in_f, out_f) so the kernel computes x @ W
    return jax.random.uniform(key, (in_f, out_f), jnp.float32, -bound, bound)


def _default_linear(key, in_f, out_f):
    # PyTorch default Linear init: U(-1/sqrt(in_f), 1/sqrt(in_f))
    bound = 1.0 / math.sqrt(in_f)
    kw, kb = jax.random.split(key)
    w = jax.random.uniform(kw, (in_f, out_f), jnp.float32, -bound, bound)
    b = jax.random.uniform(kb, (1, out_f), jnp.float32, -bound, bound)
    return w, b


def make_params(key):
    k = jax.random.split(key, 6)
    P = Param
    w_obs = _xavier_like(k[0], P.obs_feat_in_num, P.obs_feat_out_num)
    _, b_obs = _default_linear(k[1], P.obs_feat_in_num, P.obs_feat_out_num)
    w_gate = _xavier_like(k[2], P.gate_feat_in_num, P.gate_feat_out_num)
    _, b_gate = _default_linear(k[3], P.gate_feat_in_num, P.gate_feat_out_num)
    w_po, b_po = _default_linear(k[4], P.subroom_emb_size_in, P.room_emb_size)
    return dict(w_obs=w_obs, b_obs=b_obs, w_gate=w_gate, b_gate=b_gate,
                w_po=w_po, b_po=b_po)


# ------------------------------ pure-JAX reference ----------------------------
def reference_forward(sub_obs_info, sub_gate_info, p):
    B = sub_obs_info.shape[0]
    obs_emb = sub_obs_info @ p["w_obs"] + p["b_obs"]
    gate_emb = sub_gate_info @ p["w_gate"] + p["b_gate"]
    cat = jnp.concatenate([obs_emb.reshape(B, -1), gate_emb.reshape(B, -1)], axis=1)
    return jnp.maximum(cat, 0.0) @ p["w_po"] + p["b_po"]


if __name__ == "__main__":
    key = jax.random.PRNGKey(0)
    k_obs, k_gate, k_par = jax.random.split(key, 3)
    P = Param

    sub_obs_info = jax.random.normal(
        k_obs, (P.batch_size, P.max_subobs_num, P.obs_feat_in_num), jnp.float32)
    sub_gate_info = jax.random.normal(
        k_gate, (P.batch_size, P.max_subgate_num, P.gate_feat_in_num), jnp.float32)
    params = make_params(k_par)
    ref = reference_forward(sub_obs_info, sub_gate_info, params)

    # pack ONCE (hoisted out of the per-call path), reuse across forward calls
    packed_f32 = pack_weights(params, P.max_subobs_num, P.max_subgate_num,
                              compute_dtype=jnp.float32)
    packed_bf16 = pack_weights(params, P.max_subobs_num, P.max_subgate_num,
                               compute_dtype=jnp.bfloat16)

    # exact f32 path: bit-for-bit check of the fused kernel semantics
    out_f32 = jax.block_until_ready(
        obs_embedding_forward(sub_obs_info, sub_gate_info, packed_f32))
    assert out_f32.shape == (P.batch_size, P.room_emb_size)
    assert jnp.allclose(out_f32, ref, atol=2e-5, rtol=2e-5)

    # default bf16 path (bf16 MXU, f32 accumulate + epilogue)
    out_bf16 = jax.block_until_ready(
        obs_embedding_forward(sub_obs_info, sub_gate_info, packed_bf16))
    assert out_bf16.shape == (P.batch_size, P.room_emb_size)
    assert jnp.allclose(out_bf16, ref, atol=1e-2, rtol=1e-2)

    print("KERNEL_OK")
</pallas_src>

<mosaic_0001>
module attributes {stable_mosaic.version = 11 : i64} {
  func.func @obs_embedding_kernel(%arg0: i32, %arg1: memref<8x32xf32, #tpu.memory_space<vmem>>, %arg2: memref<8x32xf32, #tpu.memory_space<vmem>>, %arg3: memref<192x128xf32, #tpu.memory_space<vmem>>, %arg4: memref<8x128xf32, #tpu.memory_space<vmem>>, %arg5: memref<8x32xf32, #tpu.memory_space<vmem>>) attributes {dimension_semantics = [#tpu.dimension_semantics<parallel>], iteration_bounds = array<i64: 1>, scalar_prefetch = 0 : i64, scratch_operands = 0 : i64, tpu.core_type = #tpu.core_type<tc>, window_params = [{transform_indices = @transform_0, window_bounds = array<i64: 8, 32>}, {transform_indices = @transform_1, window_bounds = array<i64: 8, 32>}, {pipeline_mode = #tpu.pipeline_mode<synchronous>, transform_indices = @transform_2, window_bounds = array<i64: 192, 128>}, {pipeline_mode = #tpu.pipeline_mode<synchronous>, transform_indices = @transform_3, window_bounds = array<i64: 8, 128>}, {transform_indices = @transform_4, window_bounds = array<i64: 8, 32>}]} {
    %c0 = arith.constant 0 : index
    %c0_0 = arith.constant 0 : index
    %0 = vector.load %arg1[%c0, %c0_0] : memref<8x32xf32, #tpu.memory_space<vmem>>, vector<8x32xf32>
    %c0_1 = arith.constant 0 : index
    %c0_2 = arith.constant 0 : index
    %1 = vector.load %arg3[%c0_1, %c0_2] : memref<192x128xf32, #tpu.memory_space<vmem>>, vector<32x128xf32>
    %cst = arith.constant dense<0.000000e+00> : vector<8x128xf32>
    %2 = tpu.matmul %0, %1, %cst {dimension_numbers = #tpu.dot_dimension_numbers<[1], [0], [0], [1], [0, 0, 1, 1], [], []>} : vector<8x32xf32>, vector<32x128xf32>, vector<8x128xf32> -> vector<8x128xf32>
    %c0_3 = arith.constant 0 : index
    %c0_4 = arith.constant 0 : index
    %3 = vector.load %arg2[%c0_3, %c0_4] : memref<8x32xf32, #tpu.memory_space<vmem>>, vector<8x32xf32>
    %c32 = arith.constant 32 : index
    %c0_5 = arith.constant 0 : index
    %4 = vector.load %arg3[%c32, %c0_5] : memref<192x128xf32, #tpu.memory_space<vmem>>, vector<32x128xf32>
    %cst_6 = arith.constant dense<0.000000e+00> : vector<8x128xf32>
    %5 = tpu.matmul %3, %4, %cst_6 {dimension_numbers = #tpu.dot_dimension_numbers<[1], [0], [0], [1], [0, 0, 1, 1], [], []>} : vector<8x32xf32>, vector<32x128xf32>, vector<8x128xf32> -> vector<8x128xf32>
    %6 = arith.addf %2, %5 : vector<8x128xf32>
    %c0_7 = arith.constant 0 : index
    %c0_8 = arith.constant 0 : index
    %7 = vector.load %arg4[%c0_7, %c0_8] : memref<8x128xf32, #tpu.memory_space<vmem>>, vector<1x128xf32>
    %8 = vector.broadcast %7 : vector<1x128xf32> to vector<8x128xf32>
    %9 = arith.addf %6, %8 : vector<8x128xf32>
    %cst_9 = arith.constant 0.000000e+00 : f32
    %10 = vector.broadcast %cst_9 : f32 to vector<8x128xf32>
    %11 = arith.maximumf %9, %10 : vector<8x128xf32>
    %c64 = arith.constant 64 : index
    %c0_10 = arith.constant 0 : index
    %12 = vector.load %arg3[%c64, %c0_10] : memref<192x128xf32, #tpu.memory_space<vmem>>, vector<128x32xf32>
    %cst_11 = arith.constant dense<0.000000e+00> : vector<8x32xf32>
    %13 = tpu.matmul %11, %12, %cst_11 {dimension_numbers = #tpu.dot_dimension_numbers<[1], [0], [0], [1], [0, 0, 1, 1], [], []>} : vector<8x128xf32>, vector<128x32xf32>, vector<8x32xf32> -> vector<8x32xf32>
    %c1 = arith.constant 1 : index
    %c0_12 = arith.constant 0 : index
    %14 = vector.load %arg4[%c1, %c0_12] : memref<8x128xf32, #tpu.memory_space<vmem>>, vector<1x32xf32>
    %15 = vector.broadcast %14 : vector<1x32xf32> to vector<8x32xf32>
    %16 = arith.addf %13, %15 : vector<8x32xf32>
    %c0_13 = arith.constant 0 : index
    %c0_14 = arith.constant 0 : index
    %17 = vector.load %arg5[%c0_13, %c0_14] : memref<8x32xf32, #tpu.memory_space<vmem>>, vector<8x32xf32>
    tpu.vector_store %arg5[%c0_13, %c0_14], %16 {strides = array<i32>} : memref<8x32xf32, #tpu.memory_space<vmem>>, vector<8x32xf32>,
    return
  }
  func.func @transform_0(%arg0: i32) -> (i32, i32) {
    %c0_i32 = arith.constant 0 : i32
    %c0_i32_0 = arith.constant 0 : i32
    return %arg0, %c0_i32 : i32, i32
  }
  func.func @transform_1(%arg0: i32) -> (i32, i32) {
    %c0_i32 = arith.constant 0 : i32
    %c0_i32_0 = arith.constant 0 : i32
    return %arg0, %c0_i32 : i32, i32
  }
  func.func @transform_2(%arg0: i32) -> (i32, i32) {
    %c0_i32 = arith.constant 0 : i32
    %c0_i32_0 = arith.constant 0 : i32
    %c0_i32_1 = arith.constant 0 : i32
    return %c0_i32, %c0_i32_0 : i32, i32
  }
  func.func @transform_3(%arg0: i32) -> (i32, i32) {
    %c0_i32 = arith.constant 0 : i32
    %c0_i32_0 = arith.constant 0 : i32
    %c0_i32_1 = arith.constant 0 : i32
    return %c0_i32, %c0_i32_0 : i32, i32
  }
  func.func @transform_4(%arg0: i32) -> (i32, i32) {
    %c0_i32 = arith.constant 0 : i32
    %c0_i32_0 = arith.constant 0 : i32
    return %arg0, %c0_i32 : i32, i32
  }
}

</mosaic_0001>

<bundles_post_ra>
// kernel: tpu_custom_call.1
= control target key start
LH: loop header
LB: loop body
LE: loop exit
PB: predicated region body
PF: predicated region fallthrough
CT: control target
= control target key end

     0   :  { %9 = vsyncpa [#allocation3], 0  ;;  %s660_s0 = inlined_call_operand.hbm [shape: f32[8,32], index: 0, kind: input, shape index: {}]   ;;  %s661_s1 = inlined_call_operand.hbm [shape: f32[8,32], index: 1, kind: input, shape index: {}]   ;;  %s662_s2 = inlined_call_operand.hbm [shape: f32[192,128], index: 2, kind: input, shape index: {}]   ;;  %s663_s3 = inlined_call_operand.vmem [shape: f32[8,128], index: 3, kind: input, shape index: {}]   ;;  %s664_s4 = inlined_call_operand.hbm [shape: f32[8,32], index: 4, kind: output, shape index: {}]  }
   0x1   :  { %10 = vsyncpa [#allocation6], 0 }
   0x2   :  { %11 = vsyncpa [#allocation4], 0  ;;  %s554_s15 = smov [#allocation5]   ;;  %s555_s17 = smov [#allocation2]  }
   0x3   :  { %s28_s16 = sshll.u32 %s554_s15, 4  ;;  %s18_s18 = sshll.u32 %s555_s17, 4  ;;  %s29_s16 = int_to_ptr.vmem [resolvable:$true] %s28_s16  ;;  %s19_s18 = int_to_ptr.vmem [resolvable:$true] %s18_s18 }
   0x4   :  { %s460_s21 = scalar_lea.hbm %s661_s1, 128 }
   0x5   :  { %p461_p0 = scmp.ne.s32.totalorder %s661_s1, %s460_s21  ;;  %p464_p1 = scmp.lt.u32.totalorder %s460_s21, %s661_s1 }
   0x7   :  { %p466_p2 = pnand %p464_p1, %p461_p0 }
   0x9   :  { %469 = shalt.err (!%p466_p2)
}
   0xa   :  { %s470_s26 = scalar_lea.vmem %s29_s16, 128  ;;  %p475_p4 = scmp.lt.s32.totalorder %s29_s16, %s29_s16 }
   0xb   :  { %p471_p3 = scmp.ne.s32.totalorder %s29_s16, %s470_s26  ;;  %p476_p5 = scmp.lt.s32.totalorder %s470_s26, %s470_s26 }
   0xd   :  { %p477_p6 = por %p476_p5, %p475_p4 }
   0xf   :  { %p478_p7 = pnand %p477_p6, %p471_p3 }
  0x11   :  { %481 = shalt.err (!%p478_p7)
}
  0x12   :  { %31 = dma.hbm_to_vmem [thread:$0]  %s661_s1, 128, %s29_s16, [#allocation6]  }
  0x13   :  { %s482_s5 = scalar_lea.hbm %s660_s0, 128 }
  0x14   :  { %p483_p8 = scmp.ne.s32.totalorder %s660_s0, %s482_s5  ;;  %p486_p9 = scmp.lt.u32.totalorder %s482_s5, %s660_s0 }
  0x16   :  { %p488_p10 = pnand %p486_p9, %p483_p8 }
  0x18   :  { %491 = shalt.err (!%p488_p10)
}
  0x19   :  { %s492_s10 = scalar_lea.vmem %s19_s18, 128  ;;  %p497_p12 = scmp.lt.s32.totalorder %s19_s18, %s19_s18 }
  0x1a   :  { %p493_p11 = scmp.ne.s32.totalorder %s19_s18, %s492_s10  ;;  %p498_p13 = scmp.lt.s32.totalorder %s492_s10, %s492_s10 }
  0x1c   :  { %p499_p0 = por %p498_p13, %p497_p12 }
  0x1e   :  { %p500_p1 = pnand %p499_p0, %p493_p11 }
  0x20   :  { %503 = shalt.err (!%p500_p1)
}
  0x21   :  { %21 = dma.hbm_to_vmem [thread:$0]  %s660_s0, 128, %s19_s18, [#allocation3]  }
  0x22   :  { %s556_s12 = smov [#allocation7]   ;;  %s504_s16 = scalar_lea.hbm %s662_s2, 3072 }
  0x23   :  { %s37_s13 = sshll.u32 %s556_s12, 4  ;;  %p505_p2 = scmp.ne.s32.totalorder %s662_s2, %s504_s16  ;;  %s38_s13 = int_to_ptr.vmem [resolvable:$true] %s37_s13 }
  0x24   :  { %p508_p3 = scmp.lt.u32.totalorder %s504_s16, %s662_s2 }
  0x26   :  { %p510_p4 = pnand %p508_p3, %p505_p2 }
  0x28   :  { %513 = shalt.err (!%p510_p4)
}
  0x29   :  { %s514_s22 = scalar_lea.vmem %s38_s13, 3072  ;;  %p519_p6 = scmp.lt.s32.totalorder %s38_s13, %s38_s13 }
  0x2a   :  { %p515_p5 = scmp.ne.s32.totalorder %s38_s13, %s514_s22  ;;  %p520_p7 = scmp.lt.s32.totalorder %s514_s22, %s514_s22 }
  0x2c   :  { %p521_p8 = por %p520_p7, %p519_p6 }
  0x2e   :  { %p522_p9 = pnand %p521_p8, %p515_p5 }
  0x30   :  { %525 = shalt.err (!%p522_p9)
}
  0x31   :  { %s557_s0 = smov 128   ;;  %s558_s18 = smov 8  }
  0x32   :  { %43 = dma.hbm_to_vmem [thread:$0]  %s662_s2, 3072, %s38_s13, [#allocation6], %s557_s0, %s557_s0, %s558_s18  }
  0x33   :  { %548 = dma.done.wait [#allocation3], 128  }
  0x34   :  { %549 = vsyncadd [#allocation3], 4294967168 }
  0x35   :  { %550 = dma.done.wait [#allocation6], 3200  }
  0x36   :  { %551 = vsyncadd [#allocation6], 4294964096  ;;  %v559_v0 = vmov 0.0|0.0   ;;  %vm560_vm0 = vmmov 0   ;;  %v561_v1 = vmov 0.0   ;;  %v61_v2 = vld [vmem:[#allocation7 + $0x20] sm:$0xff] }
  0x37   :  { %415 = vmatprep.subr.bf16.mxu1 %v559_v0  ;;  %366 = vmatprep.mubr.msk.f32.mxu1 %vm560_vm0, %v561_v1  ;;  %v62_v3 = vld [vmem:[#allocation7 + $0x28] sm:$0xff]  ;;  %v63_v4 = vld [vmem:[#allocation7 + $0x30] sm:$0xff]  ;;  %v64_v6 = vld [vmem:[#allocation7 + $0x38] sm:$0xff]  ;;  %vm65_vm1 = vcmask 261120   ;;  %s562_s28 = smov [#allocation8]  }
  0x38   :  { %427 = vmatprep.subr.bf16.mxu0 %v559_v0  ;;  %412 = vmatprep.mubr.msk.f32.mxu0 %vm560_vm0, %v561_v1  ;;  %v416_v5 = vpack.c.bf16 %v62_v3, %v61_v2  ;;  %v419_v7 = vpack.c.bf16 %v64_v6, %v63_v4  ;;  %v56_v8 = vld [vmem:[#allocation7] sm:$0xff]  ;;  %v220_v10 = vld [vmem:[#allocation7 + $0x48] sm:$0xff]  ;;  %v221_v13 = vld [vmem:[#allocation7 + $0x50] sm:$0xff]  ;;  %s317_s29 = sshll.u32 %s562_s28, 4  ;;  %s318_s29 = int_to_ptr.vmem [resolvable:$true] %s317_s29 }
  0x39   :  { %v219_v9 = vld [vmem:[#allocation7 + $0x40] sm:$0xff]  ;;  %v57_v11 = vld [vmem:[#allocation7 + $0x8] sm:$0xff]  ;;  %v222_v14 = vld [vmem:[#allocation7 + $0x58] sm:$0xff]  ;;  %s526_s30 = scalar_lea.vmem %s318_s29, 128  ;;  %p531_p11 = scmp.lt.s32.totalorder %s318_s29, %s318_s29 }
  0x3a   :  { %417 = vmatpush3.bf16.msra.mxu1 %v416_v5  ;;  %v428_v12 = vpack.c.bf16 %v220_v10, %v219_v9  ;;  %v431_v15 = vpack.c.bf16 %v222_v14, %v221_v13  ;;  %v60_v16 = vld [vmem:[#allocation5] sm:$0xff]  ;;  %v422_v17 = vpack.c.bf16 %v57_v11, %v56_v8  ;;  %v223_v18 = vld [vmem:[#allocation7 + $0x60] sm:$0xff]  ;;  %v224_v19 = vld [vmem:[#allocation7 + $0x68] sm:$0xff]  ;;  %p527_p10 = scmp.ne.s32.totalorder %s318_s29, %s526_s30  ;;  %p532_p12 = scmp.lt.s32.totalorder %s526_s30, %s526_s30 }
  0x3b   :  { %418 = vmatprep.subr.bf16.mxu1 %v559_v0  ;;  %v58_v20 = vld [vmem:[#allocation7 + $0x10] sm:$0xff]  ;;  %v59_v21 = vld [vmem:[#allocation7 + $0x18] sm:$0xff]  ;;  %v434_v22 = vpack.c.bf16 %v224_v19, %v223_v18  ;;  %v227_v28 = vld [vmem:[#allocation7 + $0x80] sm:$0xff] }
  0x3c   :  { %429 = vmatpush3.bf16.msra.mxu0 %v428_v12  ;;  %v425_v23 = vpack.c.bf16 %v59_v21, %v58_v20  ;;  %v225_v24 = vld [vmem:[#allocation7 + $0x70] sm:$0xff]  ;;  %v226_v25 = vld [vmem:[#allocation7 + $0x78] sm:$0xff]  ;;  %v228_v29 = vld [vmem:[#allocation7 + $0x88] sm:$0xff]  ;;  %p533_p13 = por %p532_p12, %p531_p11 }
  0x3d   :  { %430 = vmatprep.subr.bf16.mxu0 %v559_v0  ;;  %v437_v26 = vpack.c.bf16 %v226_v25, %v225_v24  ;;  %v55_v27 = vld [vmem:[#allocation2] sm:$0xff]  ;;  %v440_v30 = vpack.c.bf16 %v228_v29, %v227_v28  ;;  %v230_v32 = vld [vmem:[#allocation7 + $0x98] sm:$0xff]  ;;  %v231_v34 = vld [vmem:[#allocation7 + $0xa0] sm:$0xff] }
  0x3e   :  { %420 = vmatpush3.bf16.msra.mxu1 %v419_v7  ;;  %v229_v31 = vld [vmem:[#allocation7 + $0x90] sm:$0xff]  ;;  %v232_v35 = vld [vmem:[#allocation7 + $0xa8] sm:$0xff]  ;;  %v234_v38 = vld [vmem:[#allocation7 + $0xb8] sm:$0xff]  ;;  %p534_p0 = pnand %p533_p13, %p527_p10 }
  0x3f   :  { %421 = vmatprep.subr.bf16.mxu1 %v559_v0  ;;  %v443_v33 = vpack.c.bf16 %v230_v32, %v229_v31  ;;  %v446_v36 = vpack.c.bf16 %v232_v35, %v231_v34  ;;  %v233_v37 = vld [vmem:[#allocation7 + $0xb0] sm:$0xff] }
  0x40   :  { %432 = vmatpush3.bf16.msra.mxu0 %v431_v15  ;;  %v449_v39 = vpack.c.bf16 %v234_v38, %v233_v37  ;;  %v329_v43 = vld [vmem:[%s663_s3] ss:$0 sm:$0xff]  ;;  %v330_v48 = vld [vmem:[%s663_s3 + $0x1] ss:$0 sm:$0xff] }
  0x41   :  { %367 = vmatmul.mubr.msk.f32.vlgmr.msra.gmra.mrb[0].mxu1 %vm65_vm1, %v60_v16  ;;  %433 = vmatprep.subr.bf16.mxu0 %v559_v0 }
  0x42   :  { %423 = vmatpush3.bf16.msra.mxu1 %v422_v17  ;;  %377 = vmatprep.mubr.msk.f32.mxu1 %vm560_vm0, %v561_v1 }
  0x43   :  { %424 = vmatprep.subr.bf16.mxu1 %v559_v0 }
  0x44   :  { %435 = vmatpush3.bf16.msra.mxu0 %v434_v22 }
  0x45   :  { %436 = vmatprep.subr.bf16.mxu0 %v559_v0 }
  0x46   :  { %426 = vmatpush3.bf16.msra.mxu1 %v425_v23 }
  0x48   :  { %438 = vmatpush3.bf16.msra.mxu0 %v437_v26 }
  0x49   :  { %378 = vmatmul.mubr.msk.f32.vlgmr.msra.gmra.mrb[2].mxu1 %vm65_vm1, %v55_v27  ;;  %439 = vmatprep.subr.bf16.mxu0 %v559_v0 }
  0x4c   :  { %441 = vmatpush3.bf16.msra.mxu0 %v440_v30 }
  0x4d   :  { %442 = vmatprep.subr.bf16.mxu0 %v559_v0 }
  0x50   :  { %444 = vmatpush3.bf16.msra.mxu0 %v443_v33 }
  0x51   :  { %445 = vmatprep.subr.bf16.mxu0 %v559_v0 }
  0x54   :  { %447 = vmatpush3.bf16.msra.mxu0 %v446_v36 }
  0x55   :  { %448 = vmatprep.subr.bf16.mxu0 %v559_v0 }
  0x58   :  { %450 = vmatpush3.bf16.msra.mxu0 %v449_v39 }
 0x114   :  { %v135_v40 = vpop.f32.mrb[0].mxu1 }
 0x115   :  { %v368_v41 = vpop.f32.mrb[1].mxu1 }
 0x11c   :  { %v208_v42 = vpop.f32.mrb[2].mxu1 }
 0x11d   :  { %v209_v44 = vadd.f32 %v208_v42, %v135_v40  ;;  %v379_v45 = vpop.f32.mrb[3].mxu1 }
 0x11f   :  { %v217_v46 = vadd.f32 %v329_v43, %v209_v44 }
 0x121   :  { %v218_v47 = vmax.f32 %v217_v46, 0.0 }
 0x123   :  { %413 = vmatmul.mubr.f32.vlgmr.msra.gmra.mrb[0].mxu0 %v218_v47 }
 0x1f6   :  { %v306_v49 = vpop.f32.mrb[0].mxu0 }
 0x1f7   :  { %v307_v50 = vadd.f32 %v330_v48, %v306_v49  ;;  %v414_v51 = vpop.f32.mrb[1].mxu0 }
 0x1f9   :  { %310 = vst.msk [vmem:[#allocation8] sm:$0xff] %vm65_vm1, %v307_v50 }
 0x1fa   :  { %537 = shalt.err (!%p534_p0)
}
 0x1fb   :  { %s538_s7 = scalar_lea.hbm %s664_s4, 128 }
 0x1fc   :  { %p539_p1 = scmp.ne.s32.totalorder %s664_s4, %s538_s7  ;;  %p542_p2 = scmp.lt.u32.totalorder %s538_s7, %s664_s4 }
 0x1fe   :  { %p544_p3 = pnand %p542_p2, %p539_p1 }
 0x200   :  { %547 = shalt.err (!%p544_p3)
}
 0x201   :  { %320 = dma.vmem_to_hbm [thread:$0]  %s318_s29, 128, %s664_s4, [#allocation4]  }
 0x202   :  { %552 = dma.done.wait [#allocation4], 128  }
 0x203   :  { %553 = vsyncadd [#allocation4], 4294967168 }
 0x204   :  { %324 = vsyncpa [#allocation3], 1 }
 0x205   :  { %325 = vsyncpa [#allocation6], 1 }
 0x206   :  { %326 = vsyncpa [#allocation4], 1 }

</bundles_post_ra>
